<compile_context>
chip_gen: v6e
topology: v6e:2x2x1
jax: 0.10.0
libtpu: 0.0.40
codegen_flags: <defaults>
</compile_context>

<pallas_src>
import functools

import jax
import jax.numpy as jnp
import numpy as np
from jax.experimental import pallas as pl
from jax.experimental.pallas import tpu as pltpu

BN_EPS = 1e-5
CORR_EPS = 1e-5


def _round_up(x, m):
    return ((x + m - 1) // m) * m


# ---------------------------------------------------------------------------
# Kernel 1: masked support image (lane-dense: H*W on lanes)
# ---------------------------------------------------------------------------
def _mask_kernel(img_ref, mask_ref, out_ref):
    out_ref[...] = img_ref[...] * mask_ref[...]      # (1,C,HW) * (1,1,HW)


def mask_support(support_img, support_mask):
    n, c, h, w = support_img.shape
    hw = h * w
    hw_pad = _round_up(hw, 128)
    img2 = jnp.pad(support_img.reshape(n, c, hw), ((0, 0), (0, 0), (0, hw_pad - hw)))
    m2 = jnp.pad(support_mask.reshape(n, 1, hw), ((0, 0), (0, 0), (0, hw_pad - hw)))
    out = pl.pallas_call(
        _mask_kernel,
        out_shape=jax.ShapeDtypeStruct((n, c, hw_pad), support_img.dtype),
        grid=(n,),
        in_specs=[pl.BlockSpec((1, c, hw_pad), lambda i: (i, 0, 0)),
                  pl.BlockSpec((1, 1, hw_pad), lambda i: (i, 0, 0))],
        out_specs=pl.BlockSpec((1, c, hw_pad), lambda i: (i, 0, 0)),
        compiler_params=pltpu.CompilerParams(dimension_semantics=("parallel",)),
    )(img2, m2)
    return out[:, :, :hw].reshape(n, c, h, w)


# ---------------------------------------------------------------------------
# Kernel 2: Attention_block (fused 1x1 convs + folded eval-mode BN + relu/sigmoid)
#   layout: channels on sublanes, pixels (H*W, padded to 128) on lanes.
#   gx = [x | g] stacked on channels; one matmul computes W_x x + W_g g.
#   psi = sigmoid(sum_k h[k,:] * wp[k]) -> VPU mul + sublane reduce (no N=1 MXU op).
# ---------------------------------------------------------------------------
def _attention_kernel(f_l, gx_ref, w_ref, b_ref, wp_ref, bp_ref, out_ref):
    gx = gx_ref[0].astype(jnp.float32)                              # (F_l+F_g, T)
    h = jnp.dot(w_ref[...], gx, preferred_element_type=jnp.float32) + b_ref[...]
    h = jnp.maximum(h, 0.0)                                         # (F_int, T)
    psi = jax.nn.sigmoid(jnp.sum(h * wp_ref[...], axis=0, keepdims=True)
                         + bp_ref[...])                             # (1, T)
    x = gx[:f_l, :]                                                 # (F_l, T)
    out_ref[0] = (x * psi).astype(out_ref.dtype)


def attention_block(x, g, params, tile_hw=1024):
    n, f_l, h, w = x.shape
    f_g = g.shape[1]
    f_int = params["w"].shape[0]
    hw = h * w
    hw_pad = _round_up(hw, 128)
    tile = max(128, (min(tile_hw, hw_pad) // 128) * 128)
    hw_pad = _round_up(hw_pad, tile)
    # [x | g] on channels (x first -> the in-kernel gating slice starts at row 0);
    # padded lanes are x == 0, so the gated output there is 0 and is sliced away.
    gx = jnp.concatenate([x.reshape(n, f_l, hw), g.reshape(n, f_g, hw)], axis=1)
    gx = jnp.pad(gx, ((0, 0), (0, 0), (0, hw_pad - hw)))
    kernel = functools.partial(_attention_kernel, f_l)
    out = pl.pallas_call(
        kernel,
        out_shape=jax.ShapeDtypeStruct((n, f_l, hw_pad), x.dtype),
        grid=(n, hw_pad // tile),
        in_specs=[
            pl.BlockSpec((1, f_l + f_g, tile), lambda b, t: (b, 0, t)),
            pl.BlockSpec((f_int, f_l + f_g), lambda b, t: (0, 0)),
            pl.BlockSpec((f_int, 1), lambda b, t: (0, 0)),
            pl.BlockSpec((f_int, 1), lambda b, t: (0, 0)),
            pl.BlockSpec((1, 1), lambda b, t: (0, 0)),
        ],
        out_specs=pl.BlockSpec((1, f_l, tile), lambda b, t: (b, 0, t)),
        compiler_params=pltpu.CompilerParams(
            dimension_semantics=("parallel", "parallel")),
    )(gx, params["w"], params["b"], params["wp"], params["bp"])
    return out[:, :, :hw].reshape(n, f_l, h, w)


def _fold_bn(w, b, gamma, beta, mean, var):
    # eval-mode BatchNorm folded into the preceding 1x1 conv:
    #   y = gamma * (Wx + b - mean) / sqrt(var + eps) + beta
    scale = gamma / jnp.sqrt(var + BN_EPS)
    return w * scale[None, :], (b - mean) * scale + beta


def init_attention_params(key, f_g, f_l, f_int):
    ks = jax.random.split(key, 3)

    def conv_w(kk, cin, cout):
        lim = 1.0 / np.sqrt(cin)            # PyTorch Conv2d default (k=1) init range
        return jax.random.uniform(kk, (cin, cout), jnp.float32, -lim, lim)

    def bn_params(cc):
        return (1.0 + 0.1 * jnp.arange(cc, dtype=jnp.float32),   # gamma
                0.05 * jnp.arange(cc, dtype=jnp.float32),        # beta
                0.01 * jnp.arange(cc, dtype=jnp.float32),        # running mean
                1.0 + 0.1 * jnp.arange(cc, dtype=jnp.float32))   # running var

    wg = conv_w(ks[0], f_g, f_int); bg = 0.01 * jnp.arange(f_int, dtype=jnp.float32)
    wx = conv_w(ks[1], f_l, f_int); bx = 0.02 * jnp.arange(f_int, dtype=jnp.float32)
    wp = conv_w(ks[2], f_int, 1);   bp = jnp.array([0.03], jnp.float32)
    wg, bg = _fold_bn(wg, bg, *bn_params(f_int))
    wx, bx = _fold_bn(wx, bx, *bn_params(f_int))
    wp, bp = _fold_bn(wp, bp, *bn_params(1))
    # reference (unpacked, conv-style) params
    ref = dict(wg=wg, bg=bg.reshape(1, f_int), wx=wx, bx=bx.reshape(1, f_int),
               wp=wp, bp=bp.reshape(1, 1))
    # packed kernel params: one (F_int, F_l+F_g) weight acting on [x | g]
    packed = dict(w=jnp.concatenate([wx, wg], axis=0).T,     # (f_int, f_l+f_g)
                  b=(bg + bx).reshape(f_int, 1),
                  wp=wp.reshape(f_int, 1),
                  bp=bp.reshape(1, 1))
    return packed, ref


# ---------------------------------------------------------------------------
# Kernel 3: fused cosine correlation
#   one pallas_call for all layers / batches; support and Input_masking features
#   are concatenated along the HWs (lane) axis so both correlation volumes come
#   out of a single (HWq, C) @ (C, 2*HWs_pad) MXU contraction with the query
#   normalized once.
# ---------------------------------------------------------------------------
def _corr_kernel(q_ref, s_ref, out_ref):
    q = q_ref[0, 0].astype(jnp.float32)                     # (Tq, C)
    s = s_ref[0, 0].astype(jnp.float32)                     # (C, S_pad)
    qn = q * jax.lax.rsqrt(jnp.sum(q * q, axis=-1, keepdims=True) + CORR_EPS)
    sn = s * jax.lax.rsqrt(jnp.sum(s * s, axis=0, keepdims=True) + CORR_EPS)
    corr = jnp.dot(qn, sn, preferred_element_type=jnp.float32)
    out_ref[0, 0] = jnp.maximum(corr, 0.0).astype(out_ref.dtype)


def fused_multilayer_correlation(query_feats, support_feats, masking_feats,
                                 tile_q=512):
    # NOTE: the per-layer features are stacked, which assumes uniform per-layer
    # shapes (true for the toy stand-in features used here).
    nl = len(query_feats)
    b, c, hq, wq = query_feats[0].shape
    _, _, hs, ws = support_feats[0].shape
    hwq, hws = hq * wq, hs * ws

    q = jnp.stack(query_feats, 0).reshape(nl, b, c, hwq)          # (NL,B,C,HWq)
    s = jnp.stack(support_feats, 0).reshape(nl, b, c, hws)
    m = jnp.stack(masking_feats, 0).reshape(nl, b, c, hws)

    q = jnp.transpose(q, (0, 1, 3, 2))                            # (NL,B,HWq,C)
    sm = jnp.concatenate([s, m], axis=-1)                         # (NL,B,C,2*HWs)

    n_s = 2 * hws
    s_pad = _round_up(n_s, 128)                 # lane-dense (unmasked) stores
    tile = max(8, (min(tile_q, _round_up(hwq, 8)) // 8) * 8)
    q_pad = _round_up(hwq, tile)
    q = jnp.pad(q, ((0, 0), (0, 0), (0, q_pad - hwq), (0, 0)))
    sm = jnp.pad(sm, ((0, 0), (0, 0), (0, 0), (0, s_pad - n_s)))

    corr = pl.pallas_call(
        _corr_kernel,
        out_shape=jax.ShapeDtypeStruct((nl, b, q_pad, s_pad), jnp.float32),
        grid=(nl, b, q_pad // tile),
        in_specs=[pl.BlockSpec((1, 1, tile, c), lambda l, i, t: (l, i, t, 0)),
                  pl.BlockSpec((1, 1, c, s_pad), lambda l, i, t: (l, i, 0, 0))],
        out_specs=pl.BlockSpec((1, 1, tile, s_pad), lambda l, i, t: (l, i, t, 0)),
        compiler_params=pltpu.CompilerParams(
            dimension_semantics=("parallel", "parallel", "parallel"),
            vmem_limit_bytes=64 * 1024 * 1024),
    )(q, sm)

    corr = corr[:, :, :hwq, :n_s]                                 # (NL,B,HWq,2HWs)
    corr = jnp.transpose(corr, (1, 0, 2, 3))                      # (B,NL,HWq,2HWs)
    corr_1 = corr[..., :hws].reshape(b, nl, hq, wq, hs, ws)
    corr_2 = corr[..., hws:].reshape(b, nl, hq, wq, hs, ws)
    return jnp.concatenate([corr_1, corr_2], axis=1)              # cat along dim=1


# ---------------------------------------------------------------------------
# VAT.forward (the in-kernel-implementable part)
# ---------------------------------------------------------------------------
def vat_forward(support_img, support_mask, query_feats, support_feats,
                input_masking_feats):
    # supprot_img2[:, c] = support_img[:, c] * support_mask  (Pallas kernel)
    supprot_img2 = mask_support(support_img, support_mask)
    # TODO(synk): the frozen resnet/vgg backbone (extract_feats) and the
    # align_corners bilinear resize_feats are external pretrained modules; the
    # per-layer features (query_feats, support_feats, input_masking_feats =
    # backbone(supprot_img2)) are supplied as inputs here instead.
    corr3 = fused_multilayer_correlation(query_feats, support_feats,
                                         input_masking_feats)
    # TODO(synk): hpn_learner (VATLearner) and the final F.interpolate(bilinear,
    # align_corners=True) have no in-script definition and are not emulated.
    return supprot_img2, corr3


# ---------------------------------------------------------------------------
# Pure-JAX references for correctness checks
# ---------------------------------------------------------------------------
def ref_attention(x, g, p):
    g1 = jnp.einsum('ncij,co->noij', g, p['wg']) + p['bg'].reshape(1, -1, 1, 1)
    x1 = jnp.einsum('ncij,co->noij', x, p['wx']) + p['bx'].reshape(1, -1, 1, 1)
    h = jnp.maximum(g1 + x1, 0.0)
    psi = jax.nn.sigmoid(jnp.einsum('ncij,co->noij', h, p['wp'])
                         + p['bp'].reshape(1, -1, 1, 1))
    return x * psi


def ref_corr(q, s):
    b, c, hq, wq = q.shape
    _, _, hs, ws = s.shape
    q2 = q.reshape(b, c, -1)
    s2 = s.reshape(b, c, -1)
    qn = q2 / (jnp.linalg.norm(q2, axis=1, keepdims=True) + CORR_EPS)
    sn = s2 / (jnp.linalg.norm(s2, axis=1, keepdims=True) + CORR_EPS)
    corr = jnp.maximum(jnp.einsum('bcq,bcs->bqs', qn, sn), 0.0)
    return corr.reshape(b, hq, wq, hs, ws)


if __name__ == "__main__":
    key = jax.random.PRNGKey(0)
    ks = jax.random.split(key, 16)

    B, H, W = 2, 16, 16
    support_img = jax.random.normal(ks[0], (B, 3, H, W), jnp.float32)
    support_mask = (jax.random.uniform(ks[1], (B, H, W)) > 0.5).astype(jnp.float32)

    # stand-in per-layer backbone features (3 layers, C=32, 8x8 spatial)
    C, HF, WF = 32, 8, 8
    NL = 3
    query_feats = [jax.random.normal(ks[2 + i], (B, C, HF, WF), jnp.float32)
                   for i in range(NL)]
    support_feats = [jax.random.normal(ks[5 + i], (B, C, HF, WF), jnp.float32)
                     for i in range(NL)]
    input_masking_feats = [jax.random.normal(ks[8 + i], (B, C, HF, WF), jnp.float32)
                           for i in range(NL)]

    # ---- VAT partial forward (masking + fused correlation volumes) ----
    supprot_img2, corr3 = vat_forward(support_img, support_mask,
                                      query_feats, support_feats,
                                      input_masking_feats)
    jax.block_until_ready((supprot_img2, corr3))

    np.testing.assert_allclose(
        np.asarray(supprot_img2),
        np.asarray(support_img * support_mask[:, None, :, :]),
        rtol=1e-5, atol=1e-5)
    corr3_ref = jnp.concatenate(
        [jnp.stack([ref_corr(q, s) for q, s in zip(query_feats, support_feats)], 1),
         jnp.stack([ref_corr(q, s) for q, s in zip(query_feats, input_masking_feats)], 1)],
        axis=1)
    np.testing.assert_allclose(np.asarray(corr3), np.asarray(corr3_ref),
                               rtol=1e-4, atol=1e-4)

    # ---- Attention blocks defined in VAT.__init__: Att1(3,3,3) Att2(6,6,6) Att3(4,4,4)
    att_cfgs = [(3, 16), (6, 8), (4, 8)]
    for idx, (f, sp) in enumerate(att_cfgs):
        pkey, xkey, gkey = jax.random.split(ks[11 + idx], 3)
        packed, refp = init_attention_params(pkey, f, f, f)
        x_in = jax.random.normal(xkey, (B, f, sp, sp), jnp.float32)
        g_in = jax.random.normal(gkey, (B, f, sp, sp), jnp.float32)
        out = attention_block(x_in, g_in, packed)
        jax.block_until_ready(out)
        np.testing.assert_allclose(np.asarray(out),
                                   np.asarray(ref_attention(x_in, g_in, refp)),
                                   rtol=1e-4, atol=1e-4)

    print("KERNEL_OK")
</pallas_src>

<mosaic_0001>
module attributes {stable_mosaic.version = 11 : i64} {
  func.func @_mask_kernel(%arg0: i32, %arg1: memref<1x3x256xf32, #tpu.memory_space<vmem>>, %arg2: memref<1x1x256xf32, #tpu.memory_space<vmem>>, %arg3: memref<1x3x256xf32, #tpu.memory_space<vmem>>) attributes {dimension_semantics = [#tpu.dimension_semantics<parallel>], iteration_bounds = array<i64: 2>, scalar_prefetch = 0 : i64, scratch_operands = 0 : i64, tpu.core_type = #tpu.core_type<tc>, window_params = [{transform_indices = @transform_0, window_bounds = array<i64: 1, 3, 256>}, {transform_indices = @transform_1, window_bounds = array<i64: 1, 1, 256>}, {transform_indices = @transform_2, window_bounds = array<i64: 1, 3, 256>}]} {
    %c0 = arith.constant 0 : index
    %c0_0 = arith.constant 0 : index
    %c0_1 = arith.constant 0 : index
    %0 = vector.load %arg1[%c0, %c0_0, %c0_1] : memref<1x3x256xf32, #tpu.memory_space<vmem>>, vector<1x3x256xf32>
    %c0_2 = arith.constant 0 : index
    %c0_3 = arith.constant 0 : index
    %c0_4 = arith.constant 0 : index
    %1 = vector.load %arg2[%c0_2, %c0_3, %c0_4] : memref<1x1x256xf32, #tpu.memory_space<vmem>>, vector<1x1x256xf32>
    %2 = vector.broadcast %1 : vector<1x1x256xf32> to vector<1x3x256xf32>
    %3 = arith.mulf %0, %2 : vector<1x3x256xf32>
    %c0_5 = arith.constant 0 : index
    %c0_6 = arith.constant 0 : index
    %c0_7 = arith.constant 0 : index
    %4 = vector.load %arg3[%c0_5, %c0_6, %c0_7] : memref<1x3x256xf32, #tpu.memory_space<vmem>>, vector<1x3x256xf32>
    tpu.vector_store %arg3[%c0_5, %c0_6, %c0_7], %3 {strides = array<i32>} : memref<1x3x256xf32, #tpu.memory_space<vmem>>, vector<1x3x256xf32>,
    return
  }
  func.func @transform_0(%arg0: i32) -> (i32, i32, i32) {
    %c0_i32 = arith.constant 0 : i32
    %c0_i32_0 = arith.constant 0 : i32
    %c0_i32_1 = arith.constant 0 : i32
    return %arg0, %c0_i32, %c0_i32_0 : i32, i32, i32
  }
  func.func @transform_1(%arg0: i32) -> (i32, i32, i32) {
    %c0_i32 = arith.constant 0 : i32
    %c0_i32_0 = arith.constant 0 : i32
    %c0_i32_1 = arith.constant 0 : i32
    return %arg0, %c0_i32, %c0_i32_0 : i32, i32, i32
  }
  func.func @transform_2(%arg0: i32) -> (i32, i32, i32) {
    %c0_i32 = arith.constant 0 : i32
    %c0_i32_0 = arith.constant 0 : i32
    %c0_i32_1 = arith.constant 0 : i32
    return %arg0, %c0_i32, %c0_i32_0 : i32, i32, i32
  }
}

</mosaic_0001>

<bundles_post_ra>
// kernel: tpu_custom_call.1
= control target key start
LH: loop header
LB: loop body
LE: loop exit
PB: predicated region body
PF: predicated region fallthrough
CT: control target
= control target key end

     0   :  { %s288_s9 = smov 0   ;;  %s302_s0 = inlined_call_operand.vmem [shape: f32[2,3,256], index: 0, kind: input, shape index: {}]   ;;  %s303_s1 = inlined_call_operand.vmem [shape: f32[2,1,256], index: 1, kind: input, shape index: {}]   ;;  %s304_s2 = inlined_call_operand.vmem [shape: f32[2,3,256], index: 2, kind: output, shape index: {}]  }
   0x1 LB: > { %s243_s10 = sadd.s32 4294967295, %s271_s9   ;;  %p247_p0 = scmp.ge.s32.totalorder %s271_s9, 1  ;;  %s271_s9 = sphi %s288_s9, %s12_s9  }
   0x2   : > { %p121_p1 = scmp.lt.s32.totalorder %s271_s9, 3 }
   0x4   : > { %p122_p2 = pnand %p247_p0, %p121_p1 }
   0x5   : > { %p147_p3 = scmp.lt.s32.totalorder (!%p122_p2), %s243_s10, 1 }
   0x6   : > { %125 = sbr.rel (%p122_p2) target bundleno = 24 (0x18), region = 28 }
   0xb   : > { %v164_v0 = vlaneseq  ;;  %s306_s10 = smov (!%p147_p3, %s243_s10), 1 }
   0xc   : > { %s255_s11 = sshll.u32 %s306_s10, 3  ;;  %s250_s12 = sshll.u32 %s306_s10, 1 }
   0xd   : > { %v165_v1 = vshrl.u32 %v164_v0, 7  ;;  %s151_s15 = scalar_lea.vmem %s302_s0, %s255_s11  ;;  %s155_s18 = scalar_lea.vmem %s303_s1, %s250_s12 }
   0xe   : > { %v162_v4 = vld [vmem:[%s155_s18] sm:$0x3]  ;;  %s160_s21 = scalar_lea.vmem %s304_s2, %s255_s11 }
   0xf   : > { %v166_v2 = vsub.s32 0, %v165_v1  ;;  %v170_v3 = vsub.s32 1, %v165_v1  ;;  %v161_v7 = vld [vmem:[%s151_s15] sm:$0x77] }
  0x11   : > { %v167_v5 = vrot.slane %v162_v4, %v166_v2  ;;  %v171_v6 = vrot.slane %v162_v4, %v170_v3 }
  0x13   : > { %v172_v8 = vcombine.low %v167_v5, %v171_v6 }
  0x15   : > { %v174_v9 = vmul.f32 %v172_v8, %v161_v7 }
  0x17   : > { %175 = vst [vmem:[%s160_s21] sm:$0x77] %v174_v9 }
  0x18 PF: > { %s12_s9 = sadd.s32 1, %s271_s9  }
  0x19   : > { %p9_p4 = scmp.ge.s32.totalorder %s12_s9, 4  }
  0x1b   :  { %11 = sbr.rel (!%p9_p4) target bundleno = 1 (0x1), region = 61 }

</bundles_post_ra>
